<compile_context>
chip_gen: v7x
topology: tpu7x:2x2x1
jax: 0.10.0
libtpu: 0.0.40
codegen_flags: <defaults>
</compile_context>

<pallas_src>
import math

import jax
import jax.numpy as jnp
from jax.experimental import pallas as pl
from jax.experimental.pallas import tpu as pltpu

D_MODEL = 32
D_FF = 64
LN_EPS = 1e-6


def ffn_kernel(x_ref, gamma_ref, beta_ref, w1_ref, b1_ref, w2_ref, b2_ref, o_ref):
    # x_ref:     (R, d_model)   all B*L rows at once
    # gamma/beta:(1, d_model)
    # w1_ref:    (d_model, d_ff)   already transposed (x @ w1)
    # b1_ref:    (1, d_ff)
    # w2_ref:    (d_ff, d_model)   already transposed
    # b2_ref:    (1, d_model)
    # o_ref:     (R, d_model)
    x = x_ref[...]                                            # (R, d_model) f32

    # --- LayerNorm(d_model, eps=1e-6): biased variance, like nn.LayerNorm ---
    mean = jnp.mean(x, axis=-1, keepdims=True)                # (R, 1)
    xc = x - mean
    var = jnp.mean(xc * xc, axis=-1, keepdims=True)           # (R, 1)
    inv = jax.lax.rsqrt(var + LN_EPS)                         # EUP slot
    xn = xc * inv * gamma_ref[...] + beta_ref[...]            # (R, d_model)

    # --- w_1 -> ReLU (dropout_1 is identity in eval mode) ---
    h = jnp.dot(xn, w1_ref[...], preferred_element_type=jnp.float32) + b1_ref[...]
    h = jnp.maximum(h, 0.0)                                   # (R, d_ff)

    # --- w_2 (dropout_2 is identity in eval mode) + residual ---
    y = jnp.dot(h, w2_ref[...], preferred_element_type=jnp.float32) + b2_ref[...]
    o_ref[...] = (y + x).astype(o_ref.dtype)


def positionwise_feed_forward(x, params):
    """x: (B, L, d_model) float32.  params in PyTorch layout:
       gamma (d_model,), beta (d_model,),
       w1 (d_ff, d_model), b1 (d_ff,), w2 (d_model, d_ff), b2 (d_model,)."""
    B, L, d_model = x.shape
    gamma, beta, w1, b1, w2, b2 = params
    d_ff = w1.shape[0]

    # Wrapper-side layout plumbing (free / cheap XLA reshapes & transposes):
    x2 = x.reshape(B * L, d_model)           # collapse batch & seq into rows
    w1t = w1.T                               # (d_model, d_ff)
    w2t = w2.T                               # (d_ff, d_model)
    gamma2 = gamma.reshape(1, d_model)
    beta2 = beta.reshape(1, d_model)
    b1_2 = b1.reshape(1, d_ff)
    b2_2 = b2.reshape(1, d_model)

    vmem = pl.BlockSpec(memory_space=pltpu.MemorySpace.VMEM)

    out = pl.pallas_call(
        ffn_kernel,
        out_shape=jax.ShapeDtypeStruct((B * L, d_model), x.dtype),
        in_specs=[vmem] * 7,                 # whole arrays resident in VMEM
        out_specs=vmem,                      # single invocation, no grid
    )(x2, gamma2, beta2, w1t, b1_2, w2t, b2_2)

    return out.reshape(B, L, d_model)


def reference(x, params):
    """Pure-JAX reference mirroring the PyTorch forward (eval mode)."""
    gamma, beta, w1, b1, w2, b2 = params
    mean = jnp.mean(x, axis=-1, keepdims=True)
    var = jnp.mean((x - mean) ** 2, axis=-1, keepdims=True)
    xn = (x - mean) / jnp.sqrt(var + LN_EPS) * gamma + beta
    inter = jax.nn.relu(xn @ w1.T + b1)
    out = inter @ w2.T + b2
    return out + x


def init_params(key):
    """Match nn.Linear / nn.LayerNorm default inits."""
    k1, k2, k3, k4 = jax.random.split(key, 4)
    gamma = jnp.ones((D_MODEL,), jnp.float32)
    beta = jnp.zeros((D_MODEL,), jnp.float32)
    s1 = 1.0 / math.sqrt(D_MODEL)
    s2 = 1.0 / math.sqrt(D_FF)
    w1 = jax.random.uniform(k1, (D_FF, D_MODEL), jnp.float32, -s1, s1)
    b1 = jax.random.uniform(k2, (D_FF,), jnp.float32, -s1, s1)
    w2 = jax.random.uniform(k3, (D_MODEL, D_FF), jnp.float32, -s2, s2)
    b2 = jax.random.uniform(k4, (D_MODEL,), jnp.float32, -s2, s2)
    return (gamma, beta, w1, b1, w2, b2)


if __name__ == "__main__":
    key = jax.random.PRNGKey(0)
    kx, kp = jax.random.split(key)

    B, L = 2, 8
    x = jax.random.normal(kx, (B, L, D_MODEL), dtype=jnp.float32)
    params = init_params(kp)

    out = positionwise_feed_forward(x, params)
    out = jax.block_until_ready(out)

    ref = reference(x, params)
    assert out.shape == (B, L, D_MODEL)
    assert jnp.allclose(out, ref, atol=1e-4, rtol=1e-4), "mismatch vs reference"

    print("KERNEL_OK")
</pallas_src>

<mosaic_0001>
module attributes {stable_mosaic.version = 11 : i64} {
  func.func @ffn_kernel(%arg0: memref<16x32xf32, #tpu.memory_space<vmem>>, %arg1: memref<1x32xf32, #tpu.memory_space<vmem>>, %arg2: memref<1x32xf32, #tpu.memory_space<vmem>>, %arg3: memref<32x64xf32, #tpu.memory_space<vmem>>, %arg4: memref<1x64xf32, #tpu.memory_space<vmem>>, %arg5: memref<64x32xf32, #tpu.memory_space<vmem>>, %arg6: memref<1x32xf32, #tpu.memory_space<vmem>>, %arg7: memref<16x32xf32, #tpu.memory_space<vmem>>) attributes {dimension_semantics = [], scalar_prefetch = 0 : i64, scratch_operands = 0 : i64, tpu.core_type = #tpu.core_type<tc>} {
    %c0 = arith.constant 0 : index
    %c0_0 = arith.constant 0 : index
    %0 = vector.load %arg0[%c0, %c0_0] : memref<16x32xf32, #tpu.memory_space<vmem>>, vector<16x32xf32>
    %cst = arith.constant dense<0.000000e+00> : vector<16xf32>
    %1 = vector.multi_reduction <add>, %0, %cst [1] : vector<16x32xf32> to vector<16xf32>
    %2 = vector.shape_cast %1 : vector<16xf32> to vector<16x1xf32>
    %cst_1 = arith.constant 3.200000e+01 : f32
    %3 = vector.broadcast %cst_1 : f32 to vector<16x1xf32>
    %4 = arith.divf %2, %3 : vector<16x1xf32>
    %5 = vector.broadcast %4 : vector<16x1xf32> to vector<16x32xf32>
    %6 = arith.subf %0, %5 : vector<16x32xf32>
    %7 = arith.mulf %6, %6 : vector<16x32xf32>
    %cst_2 = arith.constant dense<0.000000e+00> : vector<16xf32>
    %8 = vector.multi_reduction <add>, %7, %cst_2 [1] : vector<16x32xf32> to vector<16xf32>
    %9 = vector.shape_cast %8 : vector<16xf32> to vector<16x1xf32>
    %cst_3 = arith.constant 3.200000e+01 : f32
    %10 = vector.broadcast %cst_3 : f32 to vector<16x1xf32>
    %11 = arith.divf %9, %10 : vector<16x1xf32>
    %cst_4 = arith.constant 9.99999997E-7 : f32
    %12 = vector.broadcast %cst_4 : f32 to vector<16x1xf32>
    %13 = arith.addf %11, %12 : vector<16x1xf32>
    %14 = math.rsqrt %13 : vector<16x1xf32>
    %15 = vector.broadcast %14 : vector<16x1xf32> to vector<16x32xf32>
    %16 = arith.mulf %6, %15 : vector<16x32xf32>
    %c0_5 = arith.constant 0 : index
    %c0_6 = arith.constant 0 : index
    %17 = vector.load %arg1[%c0_5, %c0_6] : memref<1x32xf32, #tpu.memory_space<vmem>>, vector<1x32xf32>
    %18 = vector.broadcast %17 : vector<1x32xf32> to vector<16x32xf32>
    %19 = arith.mulf %16, %18 : vector<16x32xf32>
    %c0_7 = arith.constant 0 : index
    %c0_8 = arith.constant 0 : index
    %20 = vector.load %arg2[%c0_7, %c0_8] : memref<1x32xf32, #tpu.memory_space<vmem>>, vector<1x32xf32>
    %21 = vector.broadcast %20 : vector<1x32xf32> to vector<16x32xf32>
    %22 = arith.addf %19, %21 : vector<16x32xf32>
    %c0_9 = arith.constant 0 : index
    %c0_10 = arith.constant 0 : index
    %23 = vector.load %arg3[%c0_9, %c0_10] : memref<32x64xf32, #tpu.memory_space<vmem>>, vector<32x64xf32>
    %cst_11 = arith.constant dense<0.000000e+00> : vector<16x64xf32>
    %24 = tpu.matmul %22, %23, %cst_11 {dimension_numbers = #tpu.dot_dimension_numbers<[1], [0], [0], [1], [0, 0, 1, 1], [], []>} : vector<16x32xf32>, vector<32x64xf32>, vector<16x64xf32> -> vector<16x64xf32>
    %c0_12 = arith.constant 0 : index
    %c0_13 = arith.constant 0 : index
    %25 = vector.load %arg4[%c0_12, %c0_13] : memref<1x64xf32, #tpu.memory_space<vmem>>, vector<1x64xf32>
    %26 = vector.broadcast %25 : vector<1x64xf32> to vector<16x64xf32>
    %27 = arith.addf %24, %26 : vector<16x64xf32>
    %cst_14 = arith.constant 0.000000e+00 : f32
    %28 = vector.broadcast %cst_14 : f32 to vector<16x64xf32>
    %29 = arith.maximumf %27, %28 : vector<16x64xf32>
    %c0_15 = arith.constant 0 : index
    %c0_16 = arith.constant 0 : index
    %30 = vector.load %arg5[%c0_15, %c0_16] : memref<64x32xf32, #tpu.memory_space<vmem>>, vector<64x32xf32>
    %cst_17 = arith.constant dense<0.000000e+00> : vector<16x32xf32>
    %31 = tpu.matmul %29, %30, %cst_17 {dimension_numbers = #tpu.dot_dimension_numbers<[1], [0], [0], [1], [0, 0, 1, 1], [], []>} : vector<16x64xf32>, vector<64x32xf32>, vector<16x32xf32> -> vector<16x32xf32>
    %c0_18 = arith.constant 0 : index
    %c0_19 = arith.constant 0 : index
    %32 = vector.load %arg6[%c0_18, %c0_19] : memref<1x32xf32, #tpu.memory_space<vmem>>, vector<1x32xf32>
    %33 = vector.broadcast %32 : vector<1x32xf32> to vector<16x32xf32>
    %34 = arith.addf %31, %33 : vector<16x32xf32>
    %35 = arith.addf %34, %0 : vector<16x32xf32>
    %c0_20 = arith.constant 0 : index
    %c0_21 = arith.constant 0 : index
    %36 = vector.load %arg7[%c0_20, %c0_21] : memref<16x32xf32, #tpu.memory_space<vmem>>, vector<16x32xf32>
    tpu.vector_store %arg7[%c0_20, %c0_21], %35 {strides = array<i32>} : memref<16x32xf32, #tpu.memory_space<vmem>>, vector<16x32xf32>,
    return
  }
}

</mosaic_0001>

<bundles_post_ra>
// kernel: tpu_custom_call.1
= control target key start
LH: loop header
LB: loop body
LE: loop exit
PB: predicated region body
PF: predicated region fallthrough
CT: control target
= control target key end

     0   :  { %vm29_vm0 = vcmask 261120   ;;  %s522_s0 = inlined_call_operand.vmem [shape: f32[16,32], index: 0, kind: input, shape index: {}]   ;;  %s523_s1 = inlined_call_operand.vmem [shape: f32[1,32], index: 1, kind: input, shape index: {}]   ;;  %s524_s2 = inlined_call_operand.vmem [shape: f32[1,32], index: 2, kind: input, shape index: {}]   ;;  %s525_s3 = inlined_call_operand.vmem [shape: f32[32,64], index: 3, kind: input, shape index: {}]   ;;  %s526_s4 = inlined_call_operand.vmem [shape: f32[1,64], index: 4, kind: input, shape index: {}]   ;;  %s527_s5 = inlined_call_operand.vmem [shape: f32[64,32], index: 5, kind: input, shape index: {}]   ;;  %s528_s6 = inlined_call_operand.vmem [shape: f32[1,32], index: 6, kind: input, shape index: {}]   ;;  %s529_s7 = inlined_call_operand.hbm [shape: f32[16,32], index: 7, kind: output, shape index: {}]  }
   0x1   :  { %v441_v0 = vld [vmem:[%s522_s0] sm:$0xff]  ;;  %v446_v1 = vld [vmem:[%s522_s0 + $0x8] sm:$0xff] }
   0x2   :  { %12 = vsyncpa [#allocation3], 0  ;;  %v30_v2 = vsel %vm29_vm0, %v441_v0, 0.0  ;;  %v33_v3 = vsel %vm29_vm0, %v446_v1, 0.0  ;;  %v75_v14 = vld [vmem:[%s525_s3] sm:$0xff]  ;;  %v76_v15 = vld [vmem:[%s525_s3 + $0x8] sm:$0xff] }
   0x3   :  { %31 = vadd.xlane.f32.xlu0 %v30_v2  ;;  %v77_v16 = vld [vmem:[%s525_s3 + $0x10] sm:$0xff]  ;;  %v340_v17 = vpack.c.bf16 %v76_v15, %v75_v14  ;;  %v78_v18 = vld [vmem:[%s525_s3 + $0x18] sm:$0xff]  ;;  %v169_v20 = vld [vmem:[%s527_s5] sm:$0xff]  ;;  %vm184_vm1 = vcmask 523264  }
   0x4   :  { %v344_v19 = vpack.c.bf16 %v78_v18, %v77_v16  ;;  %v170_v21 = vld [vmem:[%s527_s5 + $0x8] sm:$0xff]  ;;  %v171_v22 = vld [vmem:[%s527_s5 + $0x10] sm:$0xff]  ;;  %v172_v24 = vld [vmem:[%s527_s5 + $0x18] sm:$0xff] }
   0x5   :  { %341 = vmatprep.subr.bf16.mxu0 %v340_v17  ;;  %v348_v23 = vpack.c.bf16 %v170_v21, %v169_v20  ;;  %v352_v25 = vpack.c.bf16 %v172_v24, %v171_v22  ;;  %v173_v26 = vld [vmem:[%s527_s5 + $0x20] sm:$0xff]  ;;  %v174_v27 = vld [vmem:[%s527_s5 + $0x28] sm:$0xff]  ;;  %v175_v45 = vld [vmem:[%s527_s5 + $0x30] sm:$0xff] }
   0x6   :  { %343 = vmatpush3.bf16.msra.mxu0 %v340_v17  ;;  %v356_v28 = vpack.c.bf16 %v174_v27, %v173_v26  ;;  %v286_v36 = vld [vmem:[%s523_s1] ss:$0 sm:$0xff]  ;;  %v176_v46 = vld [vmem:[%s527_s5 + $0x38] sm:$0xff]  ;;  %s395_s5 = smov [#allocation2]  }
   0x7   :  { %34 = vadd.xlane.f32.xlu0 %v33_v3  ;;  %345 = vmatprep.subr.bf16.mxu0 %v344_v19  ;;  %v287_v38 = vld [vmem:[%s524_s2] ss:$0 sm:$0xff]  ;;  %v360_v47 = vpack.c.bf16 %v176_v46, %v175_v45  ;;  %s275_s9 = sshll.u32 %s395_s5, 4  ;;  %s276_s9 = int_to_ptr.vmem [resolvable:$true] %s275_s9 }
   0x8   :  { %349 = vmatprep.subr.bf16.mxu1 %v348_v23  ;;  %v288_v48 = vld [vmem:[%s526_s4] ss:$0 sm:$0xff]  ;;  %s371_s4 = scalar_lea.vmem %s276_s9, 256  ;;  %p376_p1 = scmp.lt.s32.totalorder %s276_s9, %s276_s9 }
   0x9   :  { %351 = vmatpush3.bf16.msra.mxu1 %v348_v23  ;;  %v291_v55 = vld [vmem:[%s528_s6] ss:$0 sm:$0xff]  ;;  %p372_p0 = scmp.ne.s32.totalorder %s276_s9, %s371_s4  ;;  %p377_p2 = scmp.lt.s32.totalorder %s371_s4, %s371_s4 }
   0xa   :  { %347 = vmatpush3.bf16.msra.mxu0 %v344_v19  ;;  %353 = vmatprep.subr.bf16.mxu1 %v352_v25 }
   0xb   :  { %p378_p3 = por %p377_p2, %p376_p1 }
   0xd   :  { %355 = vmatpush3.bf16.msra.mxu1 %v352_v25  ;;  %p379_p4 = pnand %p378_p3, %p372_p0 }
   0xe   :  { %357 = vmatprep.subr.bf16.mxu1 %v356_v28 }
  0x11   :  { %359 = vmatpush3.bf16.msra.mxu1 %v356_v28 }
  0x12   :  { %361 = vmatprep.subr.bf16.mxu1 %v360_v47 }
  0x15   :  { %363 = vmatpush3.bf16.msra.mxu1 %v360_v47 }
  0x90   :  { %v32_v4 = vpop.xlane.xlu0 %31 }
  0x91   :  { %v37_v5 = vmul.f32 0.03125, %v32_v4 }
  0x93   :  { %v39_v6 = vsub.f32 %v441_v0, %v37_v5 }
  0x94   :  { %v35_v7 = vpop.xlane.xlu0 %34 }
  0x95   :  { %v38_v8 = vmul.f32 0.03125, %v35_v7  ;;  %v41_v9 = vmul.f32 %v39_v6, %v39_v6 }
  0x97   :  { %v40_v10 = vsub.f32 %v446_v1, %v38_v8  ;;  %v43_v11 = vsel %vm29_vm0, %v41_v9, 0.0 }
  0x98   :  { %44 = vadd.xlane.f32.xlu1 %v43_v11 }
  0x99   :  { %v42_v12 = vmul.f32 %v40_v10, %v40_v10 }
  0x9b   :  { %v46_v13 = vsel %vm29_vm0, %v42_v12, 0.0 }
  0x9c   :  { %47 = vadd.xlane.f32.xlu1 %v46_v13 }
 0x125   :  { %v45_v29 = vpop.xlane.xlu1 %44 }
 0x126   :  { %v49_v30 = vmul.f32 0.03125, %v45_v29 }
 0x128   :  { %v51_v31 = vadd.f32 1e-06, %v49_v30 }
 0x129   :  { %v48_v32 = vpop.xlane.xlu1 %47 }
 0x12a   :  { %367 = vrsqrt.f32 %v51_v31  ;;  %v50_v33 = vmul.f32 0.03125, %v48_v32 }
 0x12c   :  { %v52_v34 = vadd.f32 1e-06, %v50_v33 }
 0x12e   :  { %369 = vrsqrt.f32 %v52_v34 }
 0x134   :  { %v368_v35 = vpop.eup %367 }
 0x135   :  { %v55_v37 = vmul.f32 %v368_v35, %v39_v6 }
 0x137   :  { %v64_v39 = vmul.f32 %v286_v36, %v55_v37 }
 0x138   :  { %v370_v40 = vpop.eup %369 }
 0x139   :  { %v56_v41 = vmul.f32 %v370_v40, %v40_v10  ;;  %v73_v42 = vadd.f32 %v287_v38, %v64_v39 }
 0x13b   :  { %v65_v43 = vmul.f32 %v286_v36, %v56_v41  ;;  %318 = vmatprep.mubr.msk.f32.mxu0 %vm29_vm0, %v73_v42 }
 0x13d   :  { %v74_v44 = vadd.f32 %v287_v38, %v65_v43 }
 0x13f   :  { %319 = vmatmul.mubr.msk.f32.vlgmr.msra.gmra.mrb[0].mxu0 %vm29_vm0, %v74_v44 }
 0x212   :  { %v320_v49 = vpop.f32.mrb[0].mxu0 }
 0x213   :  { %v164_v50 = vadd.f32 %v320_v49, %v288_v48  ;;  %v158_v51 = vpop.f32.mrb[1].mxu0 }
 0x214   :  { %v159_v52 = vadd.f32 %v288_v48, %v158_v51 }
 0x215   :  { %v168_v54 = vmax.f32 %v164_v50, 0.0 }
 0x216   :  { %v167_v53 = vmax.f32 %v159_v52, 0.0 }
 0x218   :  { %337 = vmatprep.mubr.msk.f32.mxu1 %vm184_vm1, %v167_v53 }
 0x219   :  { %338 = vmatmul.mubr.msk.f32.vlgmr.msra.gmra.mrb[0].mxu1 %vm184_vm1, %v168_v54 }
 0x2ec   :  { %v339_v56 = vpop.f32.mrb[0].mxu1 }
 0x2ed   :  { %v263_v57 = vadd.f32 %v339_v56, %v291_v55  ;;  %v257_v58 = vpop.f32.mrb[1].mxu1 }
 0x2ee   :  { %v258_v59 = vadd.f32 %v291_v55, %v257_v58 }
 0x2ef   :  { %v267_v60 = vadd.f32 %v263_v57, %v446_v1 }
 0x2f0   :  { %v266_v61 = vadd.f32 %v258_v59, %v441_v0 }
 0x2f1   :  { %269 = vst.msk [vmem:[#allocation2 + $0x8] sm:$0xff] %vm29_vm0, %v267_v60 }
 0x2f2   :  { %268 = vst.msk [vmem:[#allocation2] sm:$0xff] %vm29_vm0, %v266_v61 }
 0x2f3   :  { %382 = shalt.err (!%p379_p4)
}
 0x2f4   :  { %s383_s11 = scalar_lea.hbm %s529_s7, 256 }
 0x2f5   :  { %p384_p5 = scmp.ne.s32.totalorder %s529_s7, %s383_s11  ;;  %p387_p6 = scmp.lt.u32.totalorder %s383_s11, %s529_s7 }
 0x2f7   :  { %p389_p7 = pnand %p387_p6, %p384_p5 }
 0x2f9   :  { %392 = shalt.err (!%p389_p7)
}
 0x2fa   :  { %s396_s16 = smov 128   ;;  %s397_s17 = smov 8  }
 0x2fb   :  { %281 = dma.vmem_to_hbm [thread:$0]  %s276_s9, 256, %s529_s7, [#allocation3], %s396_s16, %s396_s16, %s397_s17  }
 0x2fc   :  { %393 = dma.done.wait [#allocation3], 256  }
 0x2fd   :  { %394 = vsyncadd [#allocation3], 4294967040 }
 0x2fe   :  { %285 = vsyncpa [#allocation3], 1 }

</bundles_post_ra>
